<compile_context>
chip_gen: v7x
topology: tpu7x:2x2x1
jax: 0.10.0
libtpu: 0.0.40
codegen_flags: <defaults>
</compile_context>

<pallas_src>
import functools

import jax
import jax.numpy as jnp
from jax.experimental import pallas as pl
from jax.experimental.pallas import tpu as pltpu

LANE = 128      # vreg lane width
SUBLANE = 8     # vreg sublane count


def _round_up(n, m):
    return ((n + m - 1) // m) * m


# ---------------------------------------------------------------------------
# Kernels (compute_dtype closed over; weights arrive already in compute_dtype,
# biases stay f32, accumulation is always f32).
# ---------------------------------------------------------------------------
def _make_mlp_kernel(compute_dtype):
    def kernel(x_ref, w1_ref, b1_ref, w2_ref, b2_ref, wf_ref, bf_ref, out_ref):
        x = x_ref[...].astype(compute_dtype)          # cast in-kernel (VPU), not in XLA
        h = jnp.dot(x, w1_ref[...], preferred_element_type=jnp.float32) + b1_ref[...]
        h = jnp.maximum(h, 0.0)                        # f32 bias/ReLU (v5e-safe)
        h = jnp.dot(h.astype(compute_dtype), w2_ref[...],
                    preferred_element_type=jnp.float32) + b2_ref[...]
        h = jnp.maximum(h, 0.0)
        out = jnp.dot(h.astype(compute_dtype), wf_ref[...],
                      preferred_element_type=jnp.float32) + bf_ref[...]
        out_ref[...] = out.astype(out_ref.dtype)
    return kernel


def _make_final_kernel(compute_dtype):
    def kernel(x_ref, wf_ref, bf_ref, out_ref):
        x = x_ref[...].astype(compute_dtype)
        out = jnp.dot(x, wf_ref[...], preferred_element_type=jnp.float32) + bf_ref[...]
        out_ref[...] = out.astype(out_ref.dtype)
    return kernel


# ---------------------------------------------------------------------------
# One-time parameter preparation (init-time layout plumbing, NOT per call):
# pad hidden dims to the 128-lane width and cast weights to compute_dtype.
# ---------------------------------------------------------------------------
def prepare_params(params, *, use_mlp=False, compute_dtype=jnp.float32):
    in_layers, out_layers = params["wf"].shape
    hid = _round_up(in_layers, LANE)
    dh = hid - in_layers
    prep = {}
    if use_mlp:
        prep["w1"] = jnp.pad(params["w1"], ((0, 0), (0, dh))).astype(compute_dtype)
        prep["b1"] = jnp.pad(params["b1"], ((0, 0), (0, dh))).astype(jnp.float32)
        prep["w2"] = jnp.pad(params["w2"], ((0, dh), (0, dh))).astype(compute_dtype)
        prep["b2"] = jnp.pad(params["b2"], ((0, 0), (0, dh))).astype(jnp.float32)
        prep["wf"] = jnp.pad(params["wf"], ((0, dh), (0, 0))).astype(compute_dtype)
    else:
        prep["wf"] = params["wf"].astype(compute_dtype)
    prep["bf"] = params["bf"].astype(jnp.float32)      # (1, out_layers)
    return prep


# ---------------------------------------------------------------------------
# Forward wrapper
# ---------------------------------------------------------------------------
def features_net_forward(x, prepared, *, use_mlp=False, penultimate_active=False,
                         tile_b=2048):
    """Forward pass of FeaturesNet.

    x        : (B, in_layers), unpadded.
    prepared : output of prepare_params() (padded / cast weights & biases).
    """
    B, in_layers = x.shape
    out_layers = prepared["bf"].shape[1]
    compute_dtype = prepared["wf"].dtype
    out_dtype = x.dtype

    # Batch tiling: multiple-of-8 tiles, ragged (masked) last block — no wrapper
    # padding.  Keep grid >= 2 when the batch allows so the "parallel" batch axis
    # shards across both TensorCores (v7x megacore).
    tile_b = max(SUBLANE, _round_up(tile_b, SUBLANE))
    if B <= tile_b and B > 2 * SUBLANE:
        tile_b = _round_up(pl.cdiv(B, 2), SUBLANE)     # split medium batches in two
    tile_b = min(tile_b, _round_up(B, SUBLANE))
    n_tiles = pl.cdiv(B, tile_b)

    # x / out: stream only the real bytes (no 128-lane padding at HBM boundaries).
    x_spec = pl.BlockSpec((tile_b, in_layers), lambda i: (i, 0))
    out_spec = pl.BlockSpec((tile_b, out_layers), lambda i: (i, 0))
    # Weights/biases: constant index_map -> stay resident in VMEM across the grid.
    resident = lambda a: pl.BlockSpec(a.shape, lambda i: (0, 0))

    if use_mlp:
        args = (x, prepared["w1"], prepared["b1"], prepared["w2"], prepared["b2"],
                prepared["wf"], prepared["bf"])
        kernel = _make_mlp_kernel(compute_dtype)
        flops = 2 * B * (2 * in_layers * in_layers + in_layers * out_layers)
    else:
        args = (x, prepared["wf"], prepared["bf"])
        kernel = _make_final_kernel(compute_dtype)
        flops = 2 * B * in_layers * out_layers

    in_specs = [x_spec] + [resident(a) for a in args[1:]]
    weight_bytes = sum(int(a.size) * a.dtype.itemsize for a in args[1:])
    bytes_accessed = (int(x.size) * x.dtype.itemsize
                      + B * out_layers * jnp.dtype(out_dtype).itemsize
                      + weight_bytes)

    out = pl.pallas_call(
        kernel,
        out_shape=jax.ShapeDtypeStruct((B, out_layers), out_dtype),
        grid=(n_tiles,),
        in_specs=in_specs,
        out_specs=out_spec,
        compiler_params=pltpu.CompilerParams(
            dimension_semantics=("parallel",)),        # megacore / 2-TC sharding
        cost_estimate=pl.CostEstimate(flops=flops, transcendentals=0,
                                      bytes_accessed=bytes_accessed),
    )(*args)

    if penultimate_active:
        # `feats` is the raw input (captured before the MLP), per the reference.
        return x, out
    return out


# ---------------------------------------------------------------------------
# Deterministic parameter init (mimics nn.Linear: W (out,in), b (out,)),
# stored transposed for the kernel: (in, out) and (1, out).
# ---------------------------------------------------------------------------
def init_params(key, in_layers, out_layers, dtype=jnp.float32):
    ks = jax.random.split(key, 6)

    def linear_init(kw, kb, fan_in, fan_out):
        bound = 1.0 / (fan_in ** 0.5)
        w = jax.random.uniform(kw, (fan_out, fan_in), dtype, -bound, bound)  # torch layout
        b = jax.random.uniform(kb, (fan_out,), dtype, -bound, bound)
        return w.T, b.reshape(1, fan_out)

    w1, b1 = linear_init(ks[0], ks[1], in_layers, in_layers)
    w2, b2 = linear_init(ks[2], ks[3], in_layers, in_layers)
    wf, bf = linear_init(ks[4], ks[5], in_layers, out_layers)
    return dict(w1=w1, b1=b1, w2=w2, b2=b2, wf=wf, bf=bf)


def reference_forward(x, params, *, use_mlp=False, penultimate_active=False):
    feats = x
    if use_mlp:
        x = jnp.maximum(x @ params["w1"] + params["b1"], 0.0)
        x = jnp.maximum(x @ params["w2"] + params["b2"], 0.0)
    out = x @ params["wf"] + params["bf"]
    if penultimate_active:
        return feats, out
    return out


# ---------------------------------------------------------------------------
if __name__ == "__main__":
    key = jax.random.PRNGKey(0)
    k_x, k_p = jax.random.split(key)

    B, IN_LAYERS, OUT_LAYERS = 8, 32, 16
    x = jax.random.normal(k_x, (B, IN_LAYERS), dtype=jnp.float32)
    params = init_params(k_p, IN_LAYERS, OUT_LAYERS)

    # One-time (init-style) parameter preparation.
    prep_mlp = prepare_params(params, use_mlp=True)
    prep_final = prepare_params(params, use_mlp=False)
    prep_bf16 = prepare_params(params, use_mlp=True, compute_dtype=jnp.bfloat16)

    # use_mlp=True, penultimate_active=True exercises the full forward (small B).
    fwd = functools.partial(features_net_forward, use_mlp=True, penultimate_active=True)
    feats, out = fwd(x, prep_mlp)
    jax.block_until_ready(out)

    # use_mlp=False path.
    out2 = features_net_forward(x, prep_final, use_mlp=False)
    jax.block_until_ready(out2)

    # Larger batch: grid=(2,) with 2048-row tiles -> pipelining + both TCs on v7x.
    B_BIG = 4096
    x_big = jax.random.normal(k_x, (B_BIG, IN_LAYERS), dtype=jnp.float32)
    out_big = features_net_forward(x_big, prep_mlp, use_mlp=True, tile_b=2048)
    jax.block_until_ready(out_big)

    # Ragged batch (not a multiple of the tile): exercises the masked last block.
    B_RAG = 520
    x_rag = jax.random.normal(k_x, (B_RAG, IN_LAYERS), dtype=jnp.float32)
    out_rag = features_net_forward(x_rag, prep_mlp, use_mlp=True, tile_b=512)
    jax.block_until_ready(out_rag)

    # bf16-operand path (f32 accumulation) — the v6e/v7x MXU fast path.
    out_bf16 = features_net_forward(x_big, prep_bf16, use_mlp=True, tile_b=2048)
    jax.block_until_ready(out_bf16)

    # Numerical checks against plain JAX.
    _, ref_out = reference_forward(x, params, use_mlp=True, penultimate_active=True)
    ref_out2 = reference_forward(x, params, use_mlp=False)
    ref_big = reference_forward(x_big, params, use_mlp=True)
    ref_rag = reference_forward(x_rag, params, use_mlp=True)

    assert jnp.allclose(out, ref_out, atol=1e-5), "mlp path mismatch"
    assert jnp.allclose(out2, ref_out2, atol=1e-5), "final-only path mismatch"
    assert jnp.allclose(feats, x), "feats must be the untouched input"
    assert jnp.allclose(out_big, ref_big, atol=1e-4), "batched mlp path mismatch"
    assert jnp.allclose(out_rag, ref_rag, atol=1e-4), "ragged batch mismatch"
    assert jnp.allclose(out_bf16, ref_big, atol=1e-1, rtol=5e-2), "bf16 path mismatch"

    print("KERNEL_OK")
</pallas_src>

<mosaic_0001>
module attributes {stable_mosaic.version = 11 : i64} {
  func.func @kernel(%arg0: i32, %arg1: memref<8x32xf32, #tpu.memory_space<vmem>>, %arg2: memref<32x128xf32, #tpu.memory_space<vmem>>, %arg3: memref<1x128xf32, #tpu.memory_space<vmem>>, %arg4: memref<128x128xf32, #tpu.memory_space<vmem>>, %arg5: memref<1x128xf32, #tpu.memory_space<vmem>>, %arg6: memref<128x16xf32, #tpu.memory_space<vmem>>, %arg7: memref<1x16xf32, #tpu.memory_space<vmem>>, %arg8: memref<8x16xf32, #tpu.memory_space<vmem>>) attributes {dimension_semantics = [#tpu.dimension_semantics<parallel>], iteration_bounds = array<i64: 1>, scalar_prefetch = 0 : i64, scratch_operands = 0 : i64, tpu.core_type = #tpu.core_type<tc>, window_params = [{transform_indices = @transform_0, window_bounds = array<i64: 8, 32>}, {pipeline_mode = #tpu.pipeline_mode<synchronous>, transform_indices = @transform_1, window_bounds = array<i64: 32, 128>}, {pipeline_mode = #tpu.pipeline_mode<synchronous>, transform_indices = @transform_2, window_bounds = array<i64: 1, 128>}, {pipeline_mode = #tpu.pipeline_mode<synchronous>, transform_indices = @transform_3, window_bounds = array<i64: 128, 128>}, {pipeline_mode = #tpu.pipeline_mode<synchronous>, transform_indices = @transform_4, window_bounds = array<i64: 1, 128>}, {pipeline_mode = #tpu.pipeline_mode<synchronous>, transform_indices = @transform_5, window_bounds = array<i64: 128, 16>}, {pipeline_mode = #tpu.pipeline_mode<synchronous>, transform_indices = @transform_6, window_bounds = array<i64: 1, 16>}, {transform_indices = @transform_7, window_bounds = array<i64: 8, 16>}]} {
    %c0 = arith.constant 0 : index
    %c0_0 = arith.constant 0 : index
    %0 = vector.load %arg1[%c0, %c0_0] : memref<8x32xf32, #tpu.memory_space<vmem>>, vector<8x32xf32>
    %c0_1 = arith.constant 0 : index
    %c0_2 = arith.constant 0 : index
    %1 = vector.load %arg2[%c0_1, %c0_2] : memref<32x128xf32, #tpu.memory_space<vmem>>, vector<32x128xf32>
    %cst = arith.constant dense<0.000000e+00> : vector<8x128xf32>
    %2 = tpu.matmul %0, %1, %cst {dimension_numbers = #tpu.dot_dimension_numbers<[1], [0], [0], [1], [0, 0, 1, 1], [], []>} : vector<8x32xf32>, vector<32x128xf32>, vector<8x128xf32> -> vector<8x128xf32>
    %c0_3 = arith.constant 0 : index
    %c0_4 = arith.constant 0 : index
    %3 = vector.load %arg3[%c0_3, %c0_4] : memref<1x128xf32, #tpu.memory_space<vmem>>, vector<1x128xf32>
    %4 = vector.broadcast %3 : vector<1x128xf32> to vector<8x128xf32>
    %5 = arith.addf %2, %4 : vector<8x128xf32>
    %cst_5 = arith.constant 0.000000e+00 : f32
    %6 = vector.broadcast %cst_5 : f32 to vector<8x128xf32>
    %7 = arith.maximumf %5, %6 : vector<8x128xf32>
    %c0_6 = arith.constant 0 : index
    %c0_7 = arith.constant 0 : index
    %8 = vector.load %arg4[%c0_6, %c0_7] : memref<128x128xf32, #tpu.memory_space<vmem>>, vector<128x128xf32>
    %cst_8 = arith.constant dense<0.000000e+00> : vector<8x128xf32>
    %9 = tpu.matmul %7, %8, %cst_8 {dimension_numbers = #tpu.dot_dimension_numbers<[1], [0], [0], [1], [0, 0, 1, 1], [], []>} : vector<8x128xf32>, vector<128x128xf32>, vector<8x128xf32> -> vector<8x128xf32>
    %c0_9 = arith.constant 0 : index
    %c0_10 = arith.constant 0 : index
    %10 = vector.load %arg5[%c0_9, %c0_10] : memref<1x128xf32, #tpu.memory_space<vmem>>, vector<1x128xf32>
    %11 = vector.broadcast %10 : vector<1x128xf32> to vector<8x128xf32>
    %12 = arith.addf %9, %11 : vector<8x128xf32>
    %cst_11 = arith.constant 0.000000e+00 : f32
    %13 = vector.broadcast %cst_11 : f32 to vector<8x128xf32>
    %14 = arith.maximumf %12, %13 : vector<8x128xf32>
    %c0_12 = arith.constant 0 : index
    %c0_13 = arith.constant 0 : index
    %15 = vector.load %arg6[%c0_12, %c0_13] : memref<128x16xf32, #tpu.memory_space<vmem>>, vector<128x16xf32>
    %cst_14 = arith.constant dense<0.000000e+00> : vector<8x16xf32>
    %16 = tpu.matmul %14, %15, %cst_14 {dimension_numbers = #tpu.dot_dimension_numbers<[1], [0], [0], [1], [0, 0, 1, 1], [], []>} : vector<8x128xf32>, vector<128x16xf32>, vector<8x16xf32> -> vector<8x16xf32>
    %c0_15 = arith.constant 0 : index
    %c0_16 = arith.constant 0 : index
    %17 = vector.load %arg7[%c0_15, %c0_16] : memref<1x16xf32, #tpu.memory_space<vmem>>, vector<1x16xf32>
    %18 = vector.broadcast %17 : vector<1x16xf32> to vector<8x16xf32>
    %19 = arith.addf %16, %18 : vector<8x16xf32>
    %c0_17 = arith.constant 0 : index
    %c0_18 = arith.constant 0 : index
    %20 = vector.load %arg8[%c0_17, %c0_18] : memref<8x16xf32, #tpu.memory_space<vmem>>, vector<8x16xf32>
    tpu.vector_store %arg8[%c0_17, %c0_18], %19 {strides = array<i32>} : memref<8x16xf32, #tpu.memory_space<vmem>>, vector<8x16xf32>,
    return
  }
  func.func @transform_0(%arg0: i32) -> (i32, i32) {
    %c0_i32 = arith.constant 0 : i32
    %c0_i32_0 = arith.constant 0 : i32
    return %arg0, %c0_i32 : i32, i32
  }
  func.func @transform_1(%arg0: i32) -> (i32, i32) {
    %c0_i32 = arith.constant 0 : i32
    %c0_i32_0 = arith.constant 0 : i32
    %c0_i32_1 = arith.constant 0 : i32
    return %c0_i32, %c0_i32_0 : i32, i32
  }
  func.func @transform_2(%arg0: i32) -> (i32, i32) {
    %c0_i32 = arith.constant 0 : i32
    %c0_i32_0 = arith.constant 0 : i32
    %c0_i32_1 = arith.constant 0 : i32
    return %c0_i32, %c0_i32_0 : i32, i32
  }
  func.func @transform_3(%arg0: i32) -> (i32, i32) {
    %c0_i32 = arith.constant 0 : i32
    %c0_i32_0 = arith.constant 0 : i32
    %c0_i32_1 = arith.constant 0 : i32
    return %c0_i32, %c0_i32_0 : i32, i32
  }
  func.func @transform_4(%arg0: i32) -> (i32, i32) {
    %c0_i32 = arith.constant 0 : i32
    %c0_i32_0 = arith.constant 0 : i32
    %c0_i32_1 = arith.constant 0 : i32
    return %c0_i32, %c0_i32_0 : i32, i32
  }
  func.func @transform_5(%arg0: i32) -> (i32, i32) {
    %c0_i32 = arith.constant 0 : i32
    %c0_i32_0 = arith.constant 0 : i32
    %c0_i32_1 = arith.constant 0 : i32
    return %c0_i32, %c0_i32_0 : i32, i32
  }
  func.func @transform_6(%arg0: i32) -> (i32, i32) {
    %c0_i32 = arith.constant 0 : i32
    %c0_i32_0 = arith.constant 0 : i32
    %c0_i32_1 = arith.constant 0 : i32
    return %c0_i32, %c0_i32_0 : i32, i32
  }
  func.func @transform_7(%arg0: i32) -> (i32, i32) {
    %c0_i32 = arith.constant 0 : i32
    %c0_i32_0 = arith.constant 0 : i32
    return %arg0, %c0_i32 : i32, i32
  }
}

</mosaic_0001>

<bundles_post_ra>
// kernel: tpu_custom_call.1
= control target key start
LH: loop header
LB: loop body
LE: loop exit
PB: predicated region body
PF: predicated region fallthrough
CT: control target
= control target key end

     0   :  { %12 = vsyncpa [#allocation3], 0  ;;  %s765_s0 = inlined_call_operand.vmem [shape: f32[8,32], index: 0, kind: input, shape index: {}]   ;;  %s766_s1 = inlined_call_operand.hbm [shape: f32[32,128], index: 1, kind: input, shape index: {}]   ;;  %s767_s2 = inlined_call_operand.vmem [shape: f32[1,128], index: 2, kind: input, shape index: {}]   ;;  %s768_s3 = inlined_call_operand.vmem [shape: f32[128,128], index: 3, kind: input, shape index: {}]   ;;  %s769_s4 = inlined_call_operand.vmem [shape: f32[1,128], index: 4, kind: input, shape index: {}]   ;;  %s770_s5 = inlined_call_operand.vmem [shape: f32[128,16], index: 5, kind: input, shape index: {}]   ;;  %s771_s6 = inlined_call_operand.vmem [shape: f32[1,16], index: 6, kind: input, shape index: {}]   ;;  %s772_s7 = inlined_call_operand.hbm [shape: f32[8,16], index: 7, kind: output, shape index: {}]  }
   0x1   :  { %13 = vsyncpa [#allocation4], 0  ;;  %s565_s24 = smov [#allocation2]   ;;  %s517_s28 = scalar_lea.hbm %s766_s1, 512 }
   0x2   :  { %s21_s25 = sshll.u32 %s565_s24, 4  ;;  %p518_p0 = scmp.ne.s32.totalorder %s766_s1, %s517_s28  ;;  %s22_s25 = int_to_ptr.vmem [resolvable:$true] %s21_s25 }
   0x3   :  { %p521_p1 = scmp.lt.u32.totalorder %s517_s28, %s766_s1 }
   0x5   :  { %p523_p2 = pnand %p521_p1, %p518_p0 }
   0x7   :  { %526 = shalt.err (!%p523_p2)
}
   0x8   :  { %s527_s10 = scalar_lea.vmem %s22_s25, 512  ;;  %p532_p4 = scmp.lt.s32.totalorder %s22_s25, %s22_s25 }
   0x9   :  { %p528_p3 = scmp.ne.s32.totalorder %s22_s25, %s527_s10  ;;  %p533_p5 = scmp.lt.s32.totalorder %s527_s10, %s527_s10 }
   0xb   :  { %p534_p6 = por %p533_p5, %p532_p4 }
   0xd   :  { %p535_p7 = pnand %p534_p6, %p528_p3 }
   0xf   :  { %538 = shalt.err (!%p535_p7)
}
  0x10   :  { %s566_s11 = smov 128   ;;  %s567_s12 = smov 8  }
  0x11   :  { %27 = dma.hbm_to_vmem [thread:$0]  %s766_s1, 512, %s22_s25, [#allocation3], %s566_s11, %s566_s11, %s567_s12  }
  0x12   :  { %561 = dma.done.wait [#allocation3], 512  }
  0x13   :  { %562 = vsyncadd [#allocation3], 4294966784  ;;  %v568_v0 = vmov 0.0|0.0   ;;  %vm569_vm0 = vmmov 0   ;;  %v570_v1 = vmov 0.0   ;;  %v42_v2 = vld [vmem:[#allocation2] sm:$0xff] }
  0x14   :  { %456 = vmatprep.subr.bf16.mxu0 %v568_v0  ;;  %383 = vmatprep.mubr.msk.f32.mxu0 %vm569_vm0, %v570_v1  ;;  %v43_v3 = vld [vmem:[#allocation2 + $0x8] sm:$0xff]  ;;  %v44_v4 = vld [vmem:[#allocation2 + $0x10] sm:$0xff]  ;;  %v45_v6 = vld [vmem:[#allocation2 + $0x18] sm:$0xff]  ;;  %vm53_vm1 = vcmask 261120   ;;  %s571_s9 = smov [#allocation5]   ;;  %vm315_vm2 = vcmask 130048  }
  0x15   :  { %462 = vmatprep.subr.bf16.mxu1 %v568_v0  ;;  %418 = vmatprep.mubr.msk.f32.mxu1 %vm569_vm0, %v570_v1  ;;  %v457_v5 = vpack.c.bf16 %v43_v3, %v42_v2  ;;  %v128_v7 = vld [vmem:[%s768_s3] sm:$0xff]  ;;  %v129_v8 = vld [vmem:[%s768_s3 + $0x8] sm:$0xff]  ;;  %v130_v9 = vld [vmem:[%s768_s3 + $0x10] sm:$0xff]  ;;  %v460_v11 = vpack.c.bf16 %v45_v6, %v44_v4  ;;  %s323_s10 = sshll.u32 %s571_s9, 4  ;;  %s324_s10 = int_to_ptr.vmem [resolvable:$true] %s323_s10 }
  0x16   :  { %v131_v10 = vld [vmem:[%s768_s3 + $0x18] sm:$0xff]  ;;  %v463_v12 = vpack.c.bf16 %v129_v8, %v128_v7  ;;  %v132_v14 = vld [vmem:[%s768_s3 + $0x20] sm:$0xff]  ;;  %v133_v15 = vld [vmem:[%s768_s3 + $0x28] sm:$0xff]  ;;  %p544_p9 = scmp.lt.s32.totalorder %s324_s10, %s324_s10 }
  0x17   :  { %458 = vmatpush3.bf16.msra.mxu0 %v457_v5  ;;  %v466_v13 = vpack.c.bf16 %v131_v10, %v130_v9  ;;  %v41_v16 = vld [vmem:[%s765_s0] sm:$0xff]  ;;  %v469_v17 = vpack.c.bf16 %v133_v15, %v132_v14  ;;  %v134_v18 = vld [vmem:[%s768_s3 + $0x30] sm:$0xff]  ;;  %v135_v19 = vld [vmem:[%s768_s3 + $0x38] sm:$0xff] }
  0x18   :  { %459 = vmatprep.subr.bf16.mxu0 %v568_v0  ;;  %464 = vmatpush3.bf16.msra.mxu1 %v463_v12  ;;  %v472_v20 = vpack.c.bf16 %v135_v19, %v134_v18  ;;  %v136_v21 = vld [vmem:[%s768_s3 + $0x40] sm:$0xff]  ;;  %v137_v22 = vld [vmem:[%s768_s3 + $0x48] sm:$0xff]  ;;  %v138_v24 = vld [vmem:[%s768_s3 + $0x50] sm:$0xff] }
  0x19   :  { %465 = vmatprep.subr.bf16.mxu1 %v568_v0  ;;  %v475_v23 = vpack.c.bf16 %v137_v22, %v136_v21  ;;  %v139_v25 = vld [vmem:[%s768_s3 + $0x58] sm:$0xff]  ;;  %v140_v27 = vld [vmem:[%s768_s3 + $0x60] sm:$0xff]  ;;  %v141_v28 = vld [vmem:[%s768_s3 + $0x68] sm:$0xff] }
  0x1a   :  { %v478_v26 = vpack.c.bf16 %v139_v25, %v138_v24  ;;  %v481_v29 = vpack.c.bf16 %v141_v28, %v140_v27  ;;  %v142_v30 = vld [vmem:[%s768_s3 + $0x70] sm:$0xff]  ;;  %v143_v31 = vld [vmem:[%s768_s3 + $0x78] sm:$0xff]  ;;  %v222_v33 = vld [vmem:[%s770_s5] sm:$0xff] }
  0x1b   :  { %461 = vmatpush3.bf16.msra.mxu0 %v460_v11  ;;  %v484_v32 = vpack.c.bf16 %v143_v31, %v142_v30  ;;  %v223_v34 = vld [vmem:[%s770_s5 + $0x8] sm:$0xff]  ;;  %v224_v35 = vld [vmem:[%s770_s5 + $0x10] sm:$0xff]  ;;  %v225_v37 = vld [vmem:[%s770_s5 + $0x18] sm:$0xff] }
  0x1c   :  { %486 = vmatprep.subr.bf16.mxu0 %v568_v0  ;;  %467 = vmatpush3.bf16.msra.mxu1 %v466_v13  ;;  %v487_v36 = vpack.c.bf16 %v223_v34, %v222_v33  ;;  %v490_v38 = vpack.c.bf16 %v225_v37, %v224_v35  ;;  %v226_v39 = vld [vmem:[%s770_s5 + $0x20] sm:$0xff]  ;;  %v227_v40 = vld [vmem:[%s770_s5 + $0x28] sm:$0xff]  ;;  %v228_v42 = vld [vmem:[%s770_s5 + $0x30] sm:$0xff] }
  0x1d   :  { %468 = vmatprep.subr.bf16.mxu1 %v568_v0  ;;  %v493_v41 = vpack.c.bf16 %v227_v40, %v226_v39  ;;  %v229_v43 = vld [vmem:[%s770_s5 + $0x38] sm:$0xff]  ;;  %v230_v45 = vld [vmem:[%s770_s5 + $0x40] sm:$0xff]  ;;  %v231_v46 = vld [vmem:[%s770_s5 + $0x48] sm:$0xff] }
  0x1e   :  { %384 = vmatmul.mubr.msk.f32.vlgmr.msra.gmra.mrb[0].mxu0 %vm53_vm1, %v41_v16  ;;  %v496_v44 = vpack.c.bf16 %v229_v43, %v228_v42  ;;  %v499_v47 = vpack.c.bf16 %v231_v46, %v230_v45  ;;  %v232_v48 = vld [vmem:[%s770_s5 + $0x50] sm:$0xff]  ;;  %v233_v49 = vld [vmem:[%s770_s5 + $0x58] sm:$0xff]  ;;  %v234_v51 = vld [vmem:[%s770_s5 + $0x60] sm:$0xff] }
  0x1f   :  { %453 = vmatprep.mubr.msk.f32.mxu0 %vm569_vm0, %v570_v1  ;;  %488 = vmatpush3.bf16.msra.mxu0 %v487_v36  ;;  %v502_v50 = vpack.c.bf16 %v233_v49, %v232_v48  ;;  %v235_v52 = vld [vmem:[%s770_s5 + $0x68] sm:$0xff]  ;;  %v332_v54 = vld [vmem:[%s767_s2] ss:$0 sm:$0xff]  ;;  %v236_v59 = vld [vmem:[%s770_s5 + $0x70] sm:$0xff] }
  0x20   :  { %470 = vmatpush3.bf16.msra.mxu1 %v469_v17  ;;  %489 = vmatprep.subr.bf16.mxu0 %v568_v0  ;;  %v505_v53 = vpack.c.bf16 %v235_v52, %v234_v51  ;;  %v237_v60 = vld [vmem:[%s770_s5 + $0x78] sm:$0xff]  ;;  %v334_v62 = vld [vmem:[%s769_s4] ss:$0 sm:$0xff]  ;;  %s539_s5 = scalar_lea.vmem %s324_s10, 128 }
  0x21   :  { %471 = vmatprep.subr.bf16.mxu1 %v568_v0  ;;  %v508_v61 = vpack.c.bf16 %v237_v60, %v236_v59  ;;  %v335_v3 = vld [vmem:[%s771_s6] ss:$0 sm:$0xff]  ;;  %p540_p8 = scmp.ne.s32.totalorder %s324_s10, %s539_s5  ;;  %p545_p10 = scmp.lt.s32.totalorder %s539_s5, %s539_s5 }
  0x23   :  { %491 = vmatpush3.bf16.msra.mxu0 %v490_v38  ;;  %p546_p11 = por %p545_p10, %p544_p9 }
  0x24   :  { %473 = vmatpush3.bf16.msra.mxu1 %v472_v20  ;;  %492 = vmatprep.subr.bf16.mxu0 %v568_v0 }
  0x25   :  { %474 = vmatprep.subr.bf16.mxu1 %v568_v0  ;;  %p547_p12 = pnand %p546_p11, %p540_p8 }
  0x27   :  { %494 = vmatpush3.bf16.msra.mxu0 %v493_v41 }
  0x28   :  { %476 = vmatpush3.bf16.msra.mxu1 %v475_v23  ;;  %495 = vmatprep.subr.bf16.mxu0 %v568_v0 }
  0x29   :  { %477 = vmatprep.subr.bf16.mxu1 %v568_v0 }
  0x2b   :  { %497 = vmatpush3.bf16.msra.mxu0 %v496_v44 }
  0x2c   :  { %479 = vmatpush3.bf16.msra.mxu1 %v478_v26  ;;  %498 = vmatprep.subr.bf16.mxu0 %v568_v0 }
  0x2d   :  { %480 = vmatprep.subr.bf16.mxu1 %v568_v0 }
  0x2f   :  { %500 = vmatpush3.bf16.msra.mxu0 %v499_v47 }
  0x30   :  { %482 = vmatpush3.bf16.msra.mxu1 %v481_v29  ;;  %501 = vmatprep.subr.bf16.mxu0 %v568_v0 }
  0x31   :  { %483 = vmatprep.subr.bf16.mxu1 %v568_v0 }
  0x33   :  { %503 = vmatpush3.bf16.msra.mxu0 %v502_v50 }
  0x34   :  { %485 = vmatpush3.bf16.msra.mxu1 %v484_v32  ;;  %504 = vmatprep.subr.bf16.mxu0 %v568_v0 }
  0x37   :  { %506 = vmatpush3.bf16.msra.mxu0 %v505_v53 }
  0x38   :  { %507 = vmatprep.subr.bf16.mxu0 %v568_v0 }
  0x3b   :  { %509 = vmatpush3.bf16.msra.mxu0 %v508_v61 }
  0xf1   :  { %v123_v55 = vpop.f32.mrb[0].mxu0 }
  0xf2   :  { %v124_v56 = vadd.f32 %v332_v54, %v123_v55  ;;  %v385_v57 = vpop.f32.mrb[1].mxu0 }
  0xf4   :  { %v127_v58 = vmax.f32 %v124_v56, 0.0 }
  0xf6   :  { %419 = vmatmul.mubr.f32.vlgmr.msra.gmra.mrb[0].mxu1 %v127_v58 }
 0x1c9   :  { %v217_v63 = vpop.f32.mrb[0].mxu1 }
 0x1ca   :  { %v218_v0 = vadd.f32 %v334_v62, %v217_v63  ;;  %v420_v1 = vpop.f32.mrb[1].mxu1 }
 0x1cc   :  { %v221_v2 = vmax.f32 %v218_v0, 0.0 }
 0x1ce   :  { %454 = vmatmul.mubr.f32.vlgmr.msra.gmra.mrb[2].mxu0 %v221_v2 }
 0x2a1   :  { %v311_v4 = vpop.f32.mrb[2].mxu0 }
 0x2a2   :  { %v312_v5 = vadd.f32 %v335_v3, %v311_v4  ;;  %v455_v6 = vpop.f32.mrb[3].mxu0 }
 0x2a4   :  { %316 = vst.msk [vmem:[#allocation5] sm:$0xff] %vm315_vm2, %v312_v5 }
 0x2a5   :  { %550 = shalt.err (!%p547_p12)
}
 0x2a6   :  { %s551_s12 = scalar_lea.hbm %s772_s7, 128 }
 0x2a7   :  { %p552_p13 = scmp.ne.s32.totalorder %s772_s7, %s551_s12  ;;  %p555_p0 = scmp.lt.u32.totalorder %s551_s12, %s772_s7 }
 0x2a9   :  { %p557_p1 = pnand %p555_p0, %p552_p13 }
 0x2ab   :  { %560 = shalt.err (!%p557_p1)
}
 0x2ac   :  { %326 = dma.vmem_to_hbm [thread:$0]  %s324_s10, 128, %s772_s7, [#allocation4]  }
 0x2ad   :  { %563 = dma.done.wait [#allocation4], 128  }
 0x2ae   :  { %564 = vsyncadd [#allocation4], 4294967168 }
 0x2af   :  { %330 = vsyncpa [#allocation3], 1 }
 0x2b0   :  { %331 = vsyncpa [#allocation4], 1 }

</bundles_post_ra>
